<compile_context>
chip_gen: v7x
topology: tpu7x:2x2x1
jax: 0.10.0
libtpu: 0.0.40
codegen_flags: <defaults>
</compile_context>

<pallas_src>
import jax
import jax.numpy as jnp
from jax import lax
from jax.experimental import pallas as pl
from jax.experimental.pallas import tpu as pltpu

GRID_FEATURE_DIM = 256   # config['grid_feature_dim']
META_FEATURE_DIM = 128   # config['meta_feature_dim']

_TB_MAX = 512                      # max batch-tile rows
_TK = 2048                         # D_in reduction tile for the K-tiled fallback
_DIN_RESIDENT_MAX = 4096           # keep the full W_enc VMEM-resident up to this D_in
_VMEM_LIMIT_BYTES = 48 * 1024 * 1024


def _round_up(n, m):
    return ((n + m - 1) // m) * m


def _cdiv(a, b):
    return -(-a // b)


def _bridge_kernel_resident(x_ref, w_enc_ref, b_enc_ref, w_proj_ref, b_proj_ref,
                            grid_out_ref, meta_out_ref):
    """One batch tile, full D_in resident: encoder matmul + bias + ReLU, then the fused
    256->128 meta projection. x is cast to bf16 on the VPU (no extra HBM pass); both
    dots accumulate in f32 on the MXU."""
    x = x_ref[...].astype(jnp.bfloat16)
    feat = jnp.dot(x, w_enc_ref[...], preferred_element_type=jnp.float32)
    feat = jnp.maximum(feat + b_enc_ref[...], 0.0)                       # [tb, 256] f32
    grid_out_ref[...] = feat.astype(grid_out_ref.dtype)
    meta = jnp.dot(feat.astype(w_proj_ref.dtype), w_proj_ref[...],
                   preferred_element_type=jnp.float32)
    meta_out_ref[...] = (meta + b_proj_ref[...]).astype(meta_out_ref.dtype)


def _make_bridge_kernel_ktiled(d_in, tk, mask_tail):
    """K-tiled fallback for large D_in (> _DIN_RESIDENT_MAX)."""
    def kernel(x_ref, w_enc_ref, b_enc_ref, w_proj_ref, b_proj_ref,
               grid_out_ref, meta_out_ref, acc_ref):
        k = pl.program_id(1)
        xv = x_ref[...]
        wv = w_enc_ref[...]
        if mask_tail:
            # Zero out the out-of-range K tail in-kernel instead of padding x / W_enc
            # in HBM (OOB reads are unspecified; masking guarantees finite zeros so the
            # tail contributes exactly 0 to real rows).
            col = k * tk + lax.broadcasted_iota(jnp.int32, xv.shape, 1)
            xv = jnp.where(col < d_in, xv, 0.0)
            row = k * tk + lax.broadcasted_iota(jnp.int32, wv.shape, 0)
            wv = jnp.where(row < d_in, wv, jnp.zeros_like(wv))
        partial = jnp.dot(xv.astype(jnp.bfloat16), wv,
                          preferred_element_type=jnp.float32)

        @pl.when(k == 0)
        def _():
            acc_ref[...] = partial                 # store first partial: no zero-init pass

        @pl.when(k > 0)
        def _():
            acc_ref[...] += partial

        @pl.when(k == pl.num_programs(1) - 1)
        def _():
            feat = jnp.maximum(acc_ref[...] + b_enc_ref[...], 0.0)
            grid_out_ref[...] = feat.astype(grid_out_ref.dtype)
            meta = jnp.dot(feat.astype(w_proj_ref.dtype), w_proj_ref[...],
                           preferred_element_type=jnp.float32)
            meta_out_ref[...] = (meta + b_proj_ref[...]).astype(meta_out_ref.dtype)

    return kernel


def vanta_grid_former_bridge(grid_input, w_enc, b_enc, w_proj, b_proj,
                             out_dtype=jnp.float32):
    """Forward pass. Returns {'grid_features': [B, 256], 'meta_features': [B, 128]}.

    grid_input: [B, C, H, W] (NCHW); flattened row-major to [B, D_in].
    w_enc: [D_in, 256], w_proj: [256, 128] ([in, out] = transpose of PyTorch Linear weight);
    pre-cast weights to bf16 outside the hot path (the cast below is then a no-op).
    """
    B = grid_input.shape[0]
    x = grid_input.reshape(B, -1)                        # NCHW -> [B, D_in] (metadata only)
    if not jnp.issubdtype(x.dtype, jnp.floating):
        x = x.astype(jnp.float32)
    d_in = x.shape[1]

    # bf16 MXU operands for the weights (no-op if the caller already pre-cast them).
    w_enc_b = w_enc.astype(jnp.bfloat16)
    w_proj_b = w_proj.astype(jnp.bfloat16)
    b_enc_f = jnp.asarray(b_enc, jnp.float32).reshape(1, GRID_FEATURE_DIM)
    b_proj_f = jnp.asarray(b_proj, jnp.float32).reshape(1, META_FEATURE_DIM)

    # Batch tile: aim for >= 2 blocks so the "parallel" axis spans both v7x TensorCores
    # (free on v5e/v6e), capped at _TB_MAX; multiple of 16 for sublane layout.
    tb = min(_TB_MAX, _round_up(max(_cdiv(B, 2), 1), 16))
    b_pad = B
    if B < tb:
        # Tiny batches: pad up to one tile (negligible copy) for a deterministic single
        # block. Large batches are NOT padded -- the last partial block relies on masked
        # OOB loads/stores, avoiding a full extra HBM pass over x.
        b_pad = tb
        x = jnp.pad(x, ((0, tb - B), (0, 0)))
    nb = _cdiv(b_pad, tb)

    x_bytes = b_pad * d_in * x.dtype.itemsize
    out_bytes = b_pad * (GRID_FEATURE_DIM + META_FEATURE_DIM) * jnp.dtype(out_dtype).itemsize
    flops = (2 * b_pad * d_in * GRID_FEATURE_DIM
             + 2 * b_pad * GRID_FEATURE_DIM * META_FEATURE_DIM)

    if d_in <= _DIN_RESIDENT_MAX:
        # --- resident path: single grid axis over batch, W_enc read from HBM exactly once ---
        kernel = _bridge_kernel_resident
        grid = (nb,)
        in_specs = [
            pl.BlockSpec((tb, d_in), lambda i: (i, 0)),                           # x tile
            pl.BlockSpec((d_in, GRID_FEATURE_DIM), lambda i: (0, 0)),             # W_enc (resident)
            pl.BlockSpec((1, GRID_FEATURE_DIM), lambda i: (0, 0)),                # b_enc (resident)
            pl.BlockSpec((GRID_FEATURE_DIM, META_FEATURE_DIM), lambda i: (0, 0)), # W_proj (resident)
            pl.BlockSpec((1, META_FEATURE_DIM), lambda i: (0, 0)),                # b_proj (resident)
        ]
        out_specs = (
            pl.BlockSpec((tb, GRID_FEATURE_DIM), lambda i: (i, 0)),
            pl.BlockSpec((tb, META_FEATURE_DIM), lambda i: (i, 0)),
        )
        scratch_shapes = []
        dim_sem = ("parallel",)
        w_enc_reads = 1
    else:
        # --- K-tiled fallback for very large D_in (reduction axis last) ---
        tk = _TK
        nk = _cdiv(d_in, tk)
        mask_tail = (d_in % tk) != 0
        kernel = _make_bridge_kernel_ktiled(d_in, tk, mask_tail)
        grid = (nb, nk)
        in_specs = [
            pl.BlockSpec((tb, tk), lambda i, k: (i, k)),                          # x tile
            pl.BlockSpec((tk, GRID_FEATURE_DIM), lambda i, k: (k, 0)),            # W_enc tile
            pl.BlockSpec((1, GRID_FEATURE_DIM), lambda i, k: (0, 0)),
            pl.BlockSpec((GRID_FEATURE_DIM, META_FEATURE_DIM), lambda i, k: (0, 0)),
            pl.BlockSpec((1, META_FEATURE_DIM), lambda i, k: (0, 0)),
        ]
        out_specs = (
            pl.BlockSpec((tb, GRID_FEATURE_DIM), lambda i, k: (i, 0)),
            pl.BlockSpec((tb, META_FEATURE_DIM), lambda i, k: (i, 0)),
        )
        scratch_shapes = [pltpu.VMEM((tb, GRID_FEATURE_DIM), jnp.float32)]
        dim_sem = ("parallel", "arbitrary")
        w_enc_reads = nb                                   # W_enc re-streamed per batch tile

    cost = pl.CostEstimate(
        flops=flops,
        transcendentals=0,
        bytes_accessed=(x_bytes
                        + w_enc_reads * w_enc_b.size * 2
                        + w_proj_b.size * 2
                        + (b_enc_f.size + b_proj_f.size) * 4
                        + out_bytes))

    grid_features, meta_features = pl.pallas_call(
        kernel,
        out_shape=(jax.ShapeDtypeStruct((b_pad, GRID_FEATURE_DIM), out_dtype),
                   jax.ShapeDtypeStruct((b_pad, META_FEATURE_DIM), out_dtype)),
        grid_spec=pltpu.PrefetchScalarGridSpec(
            num_scalar_prefetch=0,
            grid=grid,
            in_specs=in_specs,
            out_specs=out_specs,
            scratch_shapes=scratch_shapes),
        compiler_params=pltpu.CompilerParams(
            dimension_semantics=dim_sem,
            vmem_limit_bytes=_VMEM_LIMIT_BYTES),
        cost_estimate=cost,
    )(x, w_enc_b, b_enc_f, w_proj_b, b_proj_f)

    if b_pad != B:
        grid_features = grid_features[:B]
        meta_features = meta_features[:B]
    return {'grid_features': grid_features, 'meta_features': meta_features}


def init_params(key, d_in):
    """Deterministic parameter init mirroring the PyTorch module (f32 master copies)."""
    k_enc, k_proj = jax.random.split(key)
    # Synthetic grid_former encoder: PyTorch Linear default ~ U(-1/sqrt(fan_in), +)
    bound_enc = 1.0 / float(d_in) ** 0.5
    w_enc = jax.random.uniform(k_enc, (d_in, GRID_FEATURE_DIM), jnp.float32,
                               -bound_enc, bound_enc)
    b_enc = jnp.zeros((GRID_FEATURE_DIM,), jnp.float32)
    # grid_to_meta_projection: xavier_uniform weight, zero bias
    bound_proj = (6.0 / (GRID_FEATURE_DIM + META_FEATURE_DIM)) ** 0.5
    w_proj = jax.random.uniform(k_proj, (GRID_FEATURE_DIM, META_FEATURE_DIM),
                                jnp.float32, -bound_proj, bound_proj)
    b_proj = jnp.zeros((META_FEATURE_DIM,), jnp.float32)
    return w_enc, b_enc, w_proj, b_proj


def _reference(grid_input, w_enc_b, b_enc, w_proj_b, b_proj):
    """Pure-JAX reference with identical bf16-operand / f32-accumulation semantics."""
    B = grid_input.shape[0]
    x = grid_input.reshape(B, -1).astype(jnp.bfloat16)
    feat = jnp.maximum(
        jnp.dot(x, w_enc_b.astype(jnp.bfloat16), preferred_element_type=jnp.float32)
        + b_enc.reshape(1, -1).astype(jnp.float32), 0.0)
    meta = (jnp.dot(feat.astype(jnp.bfloat16), w_proj_b.astype(jnp.bfloat16),
                    preferred_element_type=jnp.float32)
            + b_proj.reshape(1, -1).astype(jnp.float32))
    return feat, meta


if __name__ == "__main__":
    key = jax.random.PRNGKey(0)
    k_in1, k_p1, k_in2, k_p2 = jax.random.split(key, 4)

    # --- Test 1: ARC-style grid, resident-W_enc path (B=2, C=1, 16x16 colors -> D_in=256) ---
    B, C, H, W = 2, 1, 16, 16
    grid_input = jax.random.randint(k_in1, (B, C, H, W), 0, 10).astype(jnp.float32)
    w_enc, b_enc, w_proj, b_proj = init_params(k_p1, C * H * W)
    # Pre-cast weights to bf16 once, outside the hot path.
    w_enc_b, w_proj_b = w_enc.astype(jnp.bfloat16), w_proj.astype(jnp.bfloat16)

    out = vanta_grid_former_bridge(grid_input, w_enc_b, b_enc, w_proj_b, b_proj)
    jax.block_until_ready(out)

    feat_ref, meta_ref = _reference(grid_input, w_enc_b, b_enc, w_proj_b, b_proj)
    assert out['grid_features'].shape == (B, GRID_FEATURE_DIM)
    assert out['meta_features'].shape == (B, META_FEATURE_DIM)
    assert jnp.allclose(out['grid_features'], feat_ref, atol=1e-2, rtol=1e-2)
    assert jnp.allclose(out['meta_features'], meta_ref, atol=1e-2, rtol=1e-2)

    # --- Test 2: K-tiled fallback path (D_in = 4352 > resident limit, not a multiple of TK) ---
    B2, C2, H2, W2 = 5, 1, 64, 68
    grid_input2 = jax.random.normal(k_in2, (B2, C2, H2, W2), jnp.float32)
    w_enc2, b_enc2, w_proj2, b_proj2 = init_params(k_p2, C2 * H2 * W2)
    w_enc2_b, w_proj2_b = w_enc2.astype(jnp.bfloat16), w_proj2.astype(jnp.bfloat16)

    out2 = vanta_grid_former_bridge(grid_input2, w_enc2_b, b_enc2, w_proj2_b, b_proj2)
    jax.block_until_ready(out2)

    feat_ref2, meta_ref2 = _reference(grid_input2, w_enc2_b, b_enc2, w_proj2_b, b_proj2)
    assert out2['grid_features'].shape == (B2, GRID_FEATURE_DIM)
    assert out2['meta_features'].shape == (B2, META_FEATURE_DIM)
    assert jnp.allclose(out2['grid_features'], feat_ref2, atol=2e-2, rtol=2e-2)
    assert jnp.allclose(out2['meta_features'], meta_ref2, atol=2e-2, rtol=2e-2)

    print("KERNEL_OK")
</pallas_src>

<mosaic_0001>
module attributes {stable_mosaic.version = 11 : i64} {
  func.func @_bridge_kernel_resident(%arg0: i32, %arg1: memref<16x256xf32, #tpu.memory_space<vmem>>, %arg2: memref<256x256xbf16, #tpu.memory_space<vmem>>, %arg3: memref<1x256xf32, #tpu.memory_space<vmem>>, %arg4: memref<256x128xbf16, #tpu.memory_space<vmem>>, %arg5: memref<1x128xf32, #tpu.memory_space<vmem>>, %arg6: memref<16x256xf32, #tpu.memory_space<vmem>>, %arg7: memref<16x128xf32, #tpu.memory_space<vmem>>) attributes {dimension_semantics = [#tpu.dimension_semantics<parallel>], iteration_bounds = array<i64: 1>, scalar_prefetch = 0 : i64, scratch_operands = 0 : i64, tpu.core_type = #tpu.core_type<tc>, window_params = [{transform_indices = @transform_0, window_bounds = array<i64: 16, 256>}, {pipeline_mode = #tpu.pipeline_mode<synchronous>, transform_indices = @transform_1, window_bounds = array<i64: 256, 256>}, {pipeline_mode = #tpu.pipeline_mode<synchronous>, transform_indices = @transform_2, window_bounds = array<i64: 1, 256>}, {pipeline_mode = #tpu.pipeline_mode<synchronous>, transform_indices = @transform_3, window_bounds = array<i64: 256, 128>}, {pipeline_mode = #tpu.pipeline_mode<synchronous>, transform_indices = @transform_4, window_bounds = array<i64: 1, 128>}, {transform_indices = @transform_5, window_bounds = array<i64: 16, 256>}, {transform_indices = @transform_6, window_bounds = array<i64: 16, 128>}]} {
    %c0 = arith.constant 0 : index
    %c0_0 = arith.constant 0 : index
    %0 = vector.load %arg1[%c0, %c0_0] : memref<16x256xf32, #tpu.memory_space<vmem>>, vector<16x256xf32>
    %1 = arith.truncf %0 : vector<16x256xf32> to vector<16x256xbf16>
    %c0_1 = arith.constant 0 : index
    %c0_2 = arith.constant 0 : index
    %2 = vector.load %arg2[%c0_1, %c0_2] : memref<256x256xbf16, #tpu.memory_space<vmem>>, vector<256x256xbf16>
    %cst = arith.constant dense<0.000000e+00> : vector<16x256xf32>
    %3 = tpu.matmul %1, %2, %cst {dimension_numbers = #tpu.dot_dimension_numbers<[1], [0], [0], [1], [0, 0, 1, 1], [], []>} : vector<16x256xbf16>, vector<256x256xbf16>, vector<16x256xf32> -> vector<16x256xf32>
    %c0_3 = arith.constant 0 : index
    %c0_4 = arith.constant 0 : index
    %4 = vector.load %arg3[%c0_3, %c0_4] : memref<1x256xf32, #tpu.memory_space<vmem>>, vector<1x256xf32>
    %5 = vector.broadcast %4 : vector<1x256xf32> to vector<16x256xf32>
    %6 = arith.addf %3, %5 : vector<16x256xf32>
    %cst_5 = arith.constant 0.000000e+00 : f32
    %7 = vector.broadcast %cst_5 : f32 to vector<16x256xf32>
    %8 = arith.maximumf %6, %7 : vector<16x256xf32>
    %c0_6 = arith.constant 0 : index
    %c0_7 = arith.constant 0 : index
    %9 = vector.load %arg6[%c0_6, %c0_7] : memref<16x256xf32, #tpu.memory_space<vmem>>, vector<16x256xf32>
    tpu.vector_store %arg6[%c0_6, %c0_7], %8 {strides = array<i32>} : memref<16x256xf32, #tpu.memory_space<vmem>>, vector<16x256xf32>,
    %10 = arith.truncf %8 : vector<16x256xf32> to vector<16x256xbf16>
    %c0_8 = arith.constant 0 : index
    %c0_9 = arith.constant 0 : index
    %11 = vector.load %arg4[%c0_8, %c0_9] : memref<256x128xbf16, #tpu.memory_space<vmem>>, vector<256x128xbf16>
    %cst_10 = arith.constant dense<0.000000e+00> : vector<16x128xf32>
    %12 = tpu.matmul %10, %11, %cst_10 {dimension_numbers = #tpu.dot_dimension_numbers<[1], [0], [0], [1], [0, 0, 1, 1], [], []>} : vector<16x256xbf16>, vector<256x128xbf16>, vector<16x128xf32> -> vector<16x128xf32>
    %c0_11 = arith.constant 0 : index
    %c0_12 = arith.constant 0 : index
    %13 = vector.load %arg5[%c0_11, %c0_12] : memref<1x128xf32, #tpu.memory_space<vmem>>, vector<1x128xf32>
    %14 = vector.broadcast %13 : vector<1x128xf32> to vector<16x128xf32>
    %15 = arith.addf %12, %14 : vector<16x128xf32>
    %c0_13 = arith.constant 0 : index
    %c0_14 = arith.constant 0 : index
    %16 = vector.load %arg7[%c0_13, %c0_14] : memref<16x128xf32, #tpu.memory_space<vmem>>, vector<16x128xf32>
    tpu.vector_store %arg7[%c0_13, %c0_14], %15 {strides = array<i32>} : memref<16x128xf32, #tpu.memory_space<vmem>>, vector<16x128xf32>,
    return
  }
  func.func @transform_0(%arg0: i32) -> (i32, i32) {
    %c0_i32 = arith.constant 0 : i32
    %c0_i32_0 = arith.constant 0 : i32
    return %arg0, %c0_i32 : i32, i32
  }
  func.func @transform_1(%arg0: i32) -> (i32, i32) {
    %c0_i32 = arith.constant 0 : i32
    %c0_i32_0 = arith.constant 0 : i32
    %c0_i32_1 = arith.constant 0 : i32
    return %c0_i32, %c0_i32_0 : i32, i32
  }
  func.func @transform_2(%arg0: i32) -> (i32, i32) {
    %c0_i32 = arith.constant 0 : i32
    %c0_i32_0 = arith.constant 0 : i32
    %c0_i32_1 = arith.constant 0 : i32
    return %c0_i32, %c0_i32_0 : i32, i32
  }
  func.func @transform_3(%arg0: i32) -> (i32, i32) {
    %c0_i32 = arith.constant 0 : i32
    %c0_i32_0 = arith.constant 0 : i32
    %c0_i32_1 = arith.constant 0 : i32
    return %c0_i32, %c0_i32_0 : i32, i32
  }
  func.func @transform_4(%arg0: i32) -> (i32, i32) {
    %c0_i32 = arith.constant 0 : i32
    %c0_i32_0 = arith.constant 0 : i32
    %c0_i32_1 = arith.constant 0 : i32
    return %c0_i32, %c0_i32_0 : i32, i32
  }
  func.func @transform_5(%arg0: i32) -> (i32, i32) {
    %c0_i32 = arith.constant 0 : i32
    %c0_i32_0 = arith.constant 0 : i32
    return %arg0, %c0_i32 : i32, i32
  }
  func.func @transform_6(%arg0: i32) -> (i32, i32) {
    %c0_i32 = arith.constant 0 : i32
    %c0_i32_0 = arith.constant 0 : i32
    return %arg0, %c0_i32 : i32, i32
  }
}

</mosaic_0001>

<bundles_post_ra>
// kernel: tpu_custom_call.1
= control target key start
LH: loop header
LB: loop body
LE: loop exit
PB: predicated region body
PF: predicated region fallthrough
CT: control target
= control target key end

     0   :  { %12 = vsyncpa [#allocation3], 0  ;;  %s929_s0 = inlined_call_operand.hbm [shape: f32[16,256], index: 0, kind: input, shape index: {}]   ;;  %s930_s1 = inlined_call_operand.hbm [shape: bf16[256,256], index: 1, kind: input, shape index: {}]   ;;  %s931_s2 = inlined_call_operand.vmem [shape: f32[1,256], index: 2, kind: input, shape index: {}]   ;;  %s932_s3 = inlined_call_operand.hbm [shape: bf16[256,128], index: 3, kind: input, shape index: {}]   ;;  %s933_s4 = inlined_call_operand.vmem [shape: f32[1,128], index: 4, kind: input, shape index: {}]   ;;  %s934_s5 = inlined_call_operand.hbm [shape: f32[16,256], index: 5, kind: output, shape index: {0}]   ;;  %s935_s6 = inlined_call_operand.hbm [shape: f32[16,128], index: 6, kind: output, shape index: {1}]  }
   0x1   :  { %13 = vsyncpa [#allocation6], 0 }
   0x2   :  { %14 = vsyncpa [#allocation4], 0 }
   0x3   :  { %15 = vsyncpa [#allocation10], 0  ;;  %s805_s21 = smov [#allocation5]   ;;  %s687_s25 = scalar_lea.hbm %s930_s1, 4096 }
   0x4   :  { %s33_s22 = sshll.u32 %s805_s21, 4  ;;  %p688_p0 = scmp.ne.s32.totalorder %s930_s1, %s687_s25  ;;  %s34_s22 = int_to_ptr.vmem [resolvable:$true] %s33_s22 }
   0x5   :  { %p691_p1 = scmp.lt.u32.totalorder %s687_s25, %s930_s1 }
   0x7   :  { %p693_p2 = pnand %p691_p1, %p688_p0 }
   0x9   :  { %696 = shalt.err (!%p693_p2)
}
   0xa   :  { %s697_s30 = scalar_lea.vmem %s34_s22, 4096  ;;  %p702_p4 = scmp.lt.s32.totalorder %s34_s22, %s34_s22 }
   0xb   :  { %p698_p3 = scmp.ne.s32.totalorder %s34_s22, %s697_s30  ;;  %p703_p5 = scmp.lt.s32.totalorder %s697_s30, %s697_s30 }
   0xd   :  { %p704_p6 = por %p703_p5, %p702_p4 }
   0xf   :  { %p705_p7 = pnand %p704_p6, %p698_p3 }
  0x11   :  { %708 = shalt.err (!%p705_p7)
}
  0x12   :  { %s806_s7 = smov 128   ;;  %s807_s8 = smov 8  }
  0x13   :  { %39 = dma.hbm_to_vmem [thread:$0]  %s930_s1, 4096, %s34_s22, [#allocation6], %s806_s7, %s806_s7, %s807_s8  }
  0x14   :  { %s808_s11 = smov [#allocation2]   ;;  %s709_s15 = scalar_lea.hbm %s929_s0, 512 }
  0x15   :  { %s21_s12 = sshll.u32 %s808_s11, 4  ;;  %p710_p8 = scmp.ne.s32.totalorder %s929_s0, %s709_s15  ;;  %s22_s12 = int_to_ptr.vmem [resolvable:$true] %s21_s12 }
  0x16   :  { %p713_p9 = scmp.lt.u32.totalorder %s709_s15, %s929_s0 }
  0x18   :  { %p715_p10 = pnand %p713_p9, %p710_p8 }
  0x1a   :  { %718 = shalt.err (!%p715_p10)
}
  0x1b   :  { %s719_s20 = scalar_lea.vmem %s22_s12, 512  ;;  %p724_p12 = scmp.lt.s32.totalorder %s22_s12, %s22_s12 }
  0x1c   :  { %p720_p11 = scmp.ne.s32.totalorder %s22_s12, %s719_s20  ;;  %p725_p13 = scmp.lt.s32.totalorder %s719_s20, %s719_s20 }
  0x1e   :  { %p726_p0 = por %p725_p13, %p724_p12 }
  0x20   :  { %p727_p1 = pnand %p726_p0, %p720_p11 }
  0x22   :  { %730 = shalt.err (!%p727_p1)
}
  0x23   :  { %s809_s1 = smov 256   ;;  %s810_s21 = smov 16  }
  0x24   :  { %27 = dma.hbm_to_vmem [thread:$0]  %s929_s0, 512, %s22_s12, [#allocation3], %s809_s1, %s809_s1, %s810_s21  }
  0x25   :  { %s811_s24 = smov [#allocation7]   ;;  %s731_s28 = scalar_lea.hbm %s932_s3, 2048 }
  0x26   :  { %s47_s25 = sshll.u32 %s811_s24, 4  ;;  %p732_p2 = scmp.ne.s32.totalorder %s932_s3, %s731_s28  ;;  %s48_s25 = int_to_ptr.vmem [resolvable:$true] %s47_s25 }
  0x27   :  { %p735_p3 = scmp.lt.u32.totalorder %s731_s28, %s932_s3 }
  0x29   :  { %p737_p4 = pnand %p735_p3, %p732_p2 }
  0x2b   :  { %740 = shalt.err (!%p737_p4)
}
  0x2c   :  { %s741_s11 = scalar_lea.vmem %s48_s25, 2048  ;;  %p746_p6 = scmp.lt.s32.totalorder %s48_s25, %s48_s25 }
  0x2d   :  { %p742_p5 = scmp.ne.s32.totalorder %s48_s25, %s741_s11  ;;  %p747_p7 = scmp.lt.s32.totalorder %s741_s11, %s741_s11 }
  0x2f   :  { %p748_p8 = por %p747_p7, %p746_p6 }
  0x31   :  { %p749_p9 = pnand %p748_p8, %p742_p5 }
  0x33   :  { %752 = shalt.err (!%p749_p9)
}
  0x34   :  { %s812_s0 = smov 64   ;;  %s813_s12 = smov 4  }
  0x35   :  { %53 = dma.hbm_to_vmem [thread:$0]  %s932_s3, 2048, %s48_s25, [#allocation6], %s812_s0, %s812_s0, %s813_s12  }
  0x36   :  { %797 = dma.done.wait [#allocation3], 512  }
  0x37   :  { %798 = vsyncadd [#allocation3], 4294966784 }
  0x38   :  { %799 = dma.done.wait [#allocation6], 6144  }
  0x39   :  { %800 = vsyncadd [#allocation6], 4294961152  ;;  %v623_v0 = vld [vmem:[#allocation5 + $0x4] ss:$8 sps:$4 sm:$0xff]   ;;  %v625_v1 = vld [vmem:[#allocation5] ss:$8 sps:$4 sm:$0xff]   ;;  %v106_v54 = vlaneseq }
  0x3a   :  { %276 = vmatprep.subr.bf16.mxu0 %v623_v0  ;;  %v626_v2 = vld [vmem:[#allocation5 + $0x14] ss:$8 sps:$4 sm:$0xff]   ;;  %v628_v3 = vld [vmem:[#allocation5 + $0x10] ss:$8 sps:$4 sm:$0xff]   ;;  %v629_v4 = vld [vmem:[#allocation5 + $0x24] ss:$8 sps:$4 sm:$0xff]  }
  0x3b   :  { %277 = vmatpush1.bf16.msra.mxu0 %v625_v1  ;;  %v631_v5 = vld [vmem:[#allocation5 + $0x20] ss:$8 sps:$4 sm:$0xff]   ;;  %v632_v6 = vld [vmem:[#allocation5 + $0x34] ss:$8 sps:$4 sm:$0xff]   ;;  %v634_v7 = vld [vmem:[#allocation5 + $0x30] ss:$8 sps:$4 sm:$0xff]  }
  0x3c   :  { %278 = vmatprep.subr.bf16.mxu0 %v626_v2  ;;  %v635_v8 = vld [vmem:[#allocation5 + $0x44] ss:$8 sps:$4 sm:$0xff]   ;;  %v637_v9 = vld [vmem:[#allocation5 + $0x40] ss:$8 sps:$4 sm:$0xff]   ;;  %v638_v10 = vld [vmem:[#allocation5 + $0x54] ss:$8 sps:$4 sm:$0xff]  }
  0x3d   :  { %v640_v11 = vld [vmem:[#allocation5 + $0x50] ss:$8 sps:$4 sm:$0xff]   ;;  %v641_v12 = vld [vmem:[#allocation5 + $0x64] ss:$8 sps:$4 sm:$0xff]   ;;  %v643_v15 = vld [vmem:[#allocation5 + $0x60] ss:$8 sps:$4 sm:$0xff]  }
  0x3e   :  { %v67_v13 = vld [vmem:[#allocation2 + $0x8] sm:$0xff]  ;;  %v69_v14 = vld [vmem:[#allocation2 + $0x18] sm:$0xff]  ;;  %v671_v18 = vld [vmem:[#allocation7 + $0x40] sm:$0xff]   ;;  %v107_v55 = vshrl.u32 %v106_v54, 7 }
  0x3f   :  { %279 = vmatpush1.bf16.msra.mxu0 %v628_v3  ;;  %v644_v16 = vld [vmem:[#allocation5 + $0x74] ss:$8 sps:$4 sm:$0xff]   ;;  %v71_v17 = vpack.c.bf16 %v69_v14, %v67_v13  ;;  %v672_v19 = vld [vmem:[#allocation7] sm:$0xff]   ;;  %v646_v20 = vld [vmem:[#allocation5 + $0x70] ss:$8 sps:$4 sm:$0xff]   ;;  %590 = vmatprep.subr.bf16.mxu1 %v671_v18 }
  0x40   :  { %280 = vmatprep.subr.bf16.mxu0 %v629_v4  ;;  %v673_v21 = vld [vmem:[#allocation7 + $0x48] sm:$0xff]   ;;  %591 = vmatpush3.bf16.msra.mxu1 %v672_v19  ;;  %v675_v23 = vld [vmem:[#allocation7 + $0x50] sm:$0xff]   ;;  %v677_v27 = vld [vmem:[#allocation7 + $0x58] sm:$0xff]   ;;  %v108_v56 = vsub.s32 0, %v107_v55  ;;  %v112_v58 = vsub.s32 1, %v107_v55 }
  0x41   :  { %308 = vmatprep.mubr.bf16.mxu0 %v71_v17  ;;  %v674_v22 = vld [vmem:[#allocation7 + $0x8] sm:$0xff]   ;;  %592 = vmatprep.subr.bf16.mxu1 %v673_v21  ;;  %v676_v26 = vld [vmem:[#allocation7 + $0x10] sm:$0xff]   ;;  %v678_v30 = vld [vmem:[#allocation7 + $0x18] sm:$0xff]  }
  0x42   :  { %v647_v24 = vld [vmem:[#allocation5 + $0x84] ss:$8 sps:$4 sm:$0xff]   ;;  %v649_v25 = vld [vmem:[#allocation5 + $0x80] ss:$8 sps:$4 sm:$0xff]   ;;  %v650_v28 = vld [vmem:[#allocation5 + $0x94] ss:$8 sps:$4 sm:$0xff]  }
  0x43   :  { %281 = vmatpush1.bf16.msra.mxu0 %v631_v5  ;;  %v652_v29 = vld [vmem:[#allocation5 + $0x90] ss:$8 sps:$4 sm:$0xff]   ;;  %v679_v31 = vld [vmem:[#allocation7 + $0x60] sm:$0xff]   ;;  %v681_v35 = vld [vmem:[#allocation7 + $0x68] sm:$0xff]  }
  0x44   :  { %282 = vmatprep.subr.bf16.mxu0 %v632_v6  ;;  %593 = vmatpush3.bf16.msra.mxu1 %v674_v22  ;;  %v653_v32 = vld [vmem:[#allocation5 + $0xa4] ss:$8 sps:$4 sm:$0xff]   ;;  %v655_v34 = vld [vmem:[#allocation5 + $0xa0] ss:$8 sps:$4 sm:$0xff]   ;;  %v656_v36 = vld [vmem:[#allocation5 + $0xb4] ss:$8 sps:$4 sm:$0xff]  }
  0x45   :  { %594 = vmatprep.subr.bf16.mxu1 %v675_v23  ;;  %v680_v33 = vld [vmem:[#allocation7 + $0x20] sm:$0xff]   ;;  %v658_v37 = vld [vmem:[#allocation5 + $0xb0] ss:$8 sps:$4 sm:$0xff]   ;;  %v662_v40 = vld [vmem:[#allocation5 + $0xd4] ss:$8 sps:$4 sm:$0xff]  }
  0x46   :  { %v659_v38 = vld [vmem:[#allocation5 + $0xc4] ss:$8 sps:$4 sm:$0xff]   ;;  %v661_v39 = vld [vmem:[#allocation5 + $0xc0] ss:$8 sps:$4 sm:$0xff]   ;;  %v664_v41 = vld [vmem:[#allocation5 + $0xd0] ss:$8 sps:$4 sm:$0xff]  }
  0x47   :  { %283 = vmatpush1.bf16.msra.mxu0 %v634_v7  ;;  %v665_v42 = vld [vmem:[#allocation5 + $0xe4] ss:$8 sps:$4 sm:$0xff]   ;;  %v667_v43 = vld [vmem:[#allocation5 + $0xe0] ss:$8 sps:$4 sm:$0xff]   ;;  %v668_v44 = vld [vmem:[#allocation5 + $0xf4] ss:$8 sps:$4 sm:$0xff]  }
  0x48   :  { %284 = vmatprep.subr.bf16.mxu0 %v635_v8  ;;  %595 = vmatpush3.bf16.msra.mxu1 %v676_v26  ;;  %v670_v45 = vld [vmem:[#allocation5 + $0xf0] ss:$8 sps:$4 sm:$0xff]   ;;  %v66_v46 = vld [vmem:[#allocation2] sm:$0xff]  ;;  %v682_v49 = vld [vmem:[#allocation7 + $0x28] sm:$0xff]  }
  0x49   :  { %596 = vmatprep.subr.bf16.mxu1 %v677_v27  ;;  %v68_v47 = vld [vmem:[#allocation2 + $0x10] sm:$0xff]  ;;  %v685_v52 = vld [vmem:[#allocation7 + $0x78] sm:$0xff]   ;;  %v104_v57 = vld [vmem:[%s931_s2] sm:$0x3]  ;;  %s814_s2 = smov [#allocation8]  }
  0x4a   :  { %v70_v48 = vpack.c.bf16 %v68_v47, %v66_v46  ;;  %v683_v50 = vld [vmem:[#allocation7 + $0x70] sm:$0xff]   ;;  %v686_v53 = vld [vmem:[#allocation7 + $0x38] sm:$0xff]   ;;  %v109_v59 = vrot.slane %v104_v57, %v108_v56  ;;  %v113_v60 = vrot.slane %v104_v57, %v112_v58  ;;  %s512_s16 = sshll.u32 %s814_s2, 4  ;;  %s513_s16 = int_to_ptr.vmem [resolvable:$true] %s512_s16 }
  0x4b   :  { %285 = vmatpush1.bf16.msra.mxu0 %v637_v9  ;;  %v684_v51 = vld [vmem:[#allocation7 + $0x30] sm:$0xff]   ;;  %s753_s17 = scalar_lea.vmem %s513_s16, 512  ;;  %p758_p11 = scmp.lt.s32.totalorder %s513_s16, %s513_s16 }
  0x4c   :  { %286 = vmatprep.subr.bf16.mxu0 %v638_v10  ;;  %597 = vmatpush3.bf16.msra.mxu1 %v678_v30  ;;  %p754_p10 = scmp.ne.s32.totalorder %s513_s16, %s753_s17  ;;  %p759_p12 = scmp.lt.s32.totalorder %s753_s17, %s753_s17 }
  0x4d   :  { %598 = vmatprep.subr.bf16.mxu1 %v679_v31 }
  0x4e   :  { %p760_p13 = por %p759_p12, %p758_p11 }
  0x4f   :  { %287 = vmatpush1.bf16.msra.mxu0 %v640_v11 }
  0x50   :  { %288 = vmatprep.subr.bf16.mxu0 %v641_v12  ;;  %599 = vmatpush3.bf16.msra.mxu1 %v680_v33  ;;  %p761_p0 = pnand %p760_p13, %p754_p10 }
  0x51   :  { %600 = vmatprep.subr.bf16.mxu1 %v681_v35 }
  0x53   :  { %289 = vmatpush1.bf16.msra.mxu0 %v643_v15 }
  0x54   :  { %290 = vmatprep.subr.bf16.mxu0 %v644_v16  ;;  %601 = vmatpush3.bf16.msra.mxu1 %v682_v49 }
  0x55   :  { %602 = vmatprep.subr.bf16.mxu1 %v683_v50 }
  0x57   :  { %291 = vmatpush1.bf16.msra.mxu0 %v646_v20 }
  0x58   :  { %292 = vmatprep.subr.bf16.mxu0 %v647_v24  ;;  %603 = vmatpush3.bf16.msra.mxu1 %v684_v51 }
  0x59   :  { %604 = vmatprep.subr.bf16.mxu1 %v685_v52 }
  0x5b   :  { %293 = vmatpush1.bf16.msra.mxu0 %v649_v25 }
  0x5c   :  { %294 = vmatprep.subr.bf16.mxu0 %v650_v28  ;;  %605 = vmatpush3.bf16.msra.mxu1 %v686_v53 }
  0x5f   :  { %295 = vmatpush1.bf16.msra.mxu0 %v652_v29 }
  0x60   :  { %296 = vmatprep.subr.bf16.mxu0 %v653_v32 }
  0x63   :  { %297 = vmatpush1.bf16.msra.mxu0 %v655_v34 }
  0x64   :  { %298 = vmatprep.subr.bf16.mxu0 %v656_v36 }
  0x67   :  { %299 = vmatpush1.bf16.msra.mxu0 %v658_v37 }
  0x68   :  { %300 = vmatprep.subr.bf16.mxu0 %v659_v38 }
  0x6b   :  { %301 = vmatpush1.bf16.msra.mxu0 %v661_v39 }
  0x6c   :  { %302 = vmatprep.subr.bf16.mxu0 %v662_v40 }
  0x6f   :  { %303 = vmatpush1.bf16.msra.mxu0 %v664_v41 }
  0x70   :  { %304 = vmatprep.subr.bf16.mxu0 %v665_v42 }
  0x73   :  { %305 = vmatpush1.bf16.msra.mxu0 %v667_v43 }
  0x74   :  { %306 = vmatprep.subr.bf16.mxu0 %v668_v44 }
  0x77   :  { %307 = vmatpush1.bf16.msra.mxu0 %v670_v45 }
  0x7a   :  { %309 = vmatmul.mubr.bf16.vlgmr.msra.gmra.mrb[0].mxu0 %v70_v48 }
 0x14d   :  { %v310_v61 = vpop.f32.mrb[0].mxu0 }
 0x14e   :  { %v311_v62 = vadd.f32 %v310_v61, %v109_v59  ;;  %v312_v63 = vpop.f32.mrb[1].mxu0 }
 0x14f   :  { %v313_v0 = vadd.f32 %v312_v63, %v113_v60  ;;  %v314_v1 = vpop.f32.mrb[2].mxu0 }
 0x150   :  { %v319_v2 = vmax.f32 %v311_v62, 0.0  ;;  %v315_v3 = vadd.f32 %v314_v1, %v109_v59  ;;  %v316_v4 = vpop.f32.mrb[3].mxu0 }
 0x151   :  { %v320_v5 = vmax.f32 %v313_v0, 0.0  ;;  %v317_v6 = vadd.f32 %v316_v4, %v113_v60 }
 0x152   :  { %323 = vst [vmem:[#allocation8] sm:$0xff] %v319_v2  ;;  %v321_v7 = vmax.f32 %v315_v3, 0.0 }
 0x153   :  { %324 = vst [vmem:[#allocation8 + $0x8] sm:$0xff] %v320_v5  ;;  %v322_v8 = vmax.f32 %v317_v6, 0.0 }
 0x154   :  { %325 = vst [vmem:[#allocation8 + $0x10] sm:$0xff] %v321_v7  ;;  %v327_v9 = vpack.c.bf16 %v321_v7, %v319_v2 }
 0x155   :  { %326 = vst [vmem:[#allocation8 + $0x18] sm:$0xff] %v322_v8  ;;  %v328_v10 = vpack.c.bf16 %v322_v8, %v320_v5 }
 0x157   :  { %496 = vmatprep.mubr.bf16.mxu1 %v328_v10 }
 0x158   :  { %497 = vmatmul.mubr.bf16.vlgmr.msra.gmra.mrb[0].mxu1 %v327_v9 }
 0x159   :  { %764 = shalt.err (!%p761_p0)
}
 0x15a   :  { %s765_s20 = scalar_lea.hbm %s934_s5, 512 }
 0x15b   :  { %p766_p1 = scmp.ne.s32.totalorder %s934_s5, %s765_s20  ;;  %p769_p2 = scmp.lt.u32.totalorder %s765_s20, %s934_s5 }
 0x15d   :  { %p771_p3 = pnand %p769_p2, %p766_p1 }
 0x15f   :  { %774 = shalt.err (!%p771_p3)
}
 0x160   :  { %518 = dma.vmem_to_hbm [thread:$0]  %s513_s16, 512, %s934_s5, [#allocation4], %s809_s1, %s809_s1, %s810_s21  }
 0x161   :  { %v573_v12 = vld [vmem:[%s933_s4] ss:$0 sm:$0xff]  ;;  %s815_s30 = smov [#allocation9]  }
 0x162   :  { %s524_s9 = sshll.u32 %s815_s30, 4  ;;  %s525_s9 = int_to_ptr.vmem [resolvable:$true] %s524_s9 }
 0x163   :  { %s775_s10 = scalar_lea.vmem %s525_s9, 256  ;;  %p780_p5 = scmp.lt.s32.totalorder %s525_s9, %s525_s9 }
 0x164   :  { %p776_p4 = scmp.ne.s32.totalorder %s525_s9, %s775_s10  ;;  %p781_p6 = scmp.lt.s32.totalorder %s775_s10, %s775_s10 }
 0x166   :  { %p782_p7 = por %p781_p6, %p780_p5 }
 0x168   :  { %p783_p8 = pnand %p782_p7, %p776_p4 }
 0x22b   :  { %v606_v11 = vpop.f32.mrb[0].mxu1 }
 0x22c   :  { %v607_v13 = vpop.f32.mrb[1].mxu1 }
 0x22d   :  { %v608_v14 = vadd.f32 %v607_v13, %v606_v11  ;;  %v609_v15 = vpop.f32.mrb[2].mxu1 }
 0x22e   :  { %v610_v16 = vpop.f32.mrb[3].mxu1 }
 0x22f   :  { %v499_v17 = vadd.f32 %v608_v14, %v573_v12  ;;  %v611_v18 = vadd.f32 %v610_v16, %v609_v15 }
 0x231   :  { %505 = vst [vmem:[#allocation9] sm:$0xff] %v499_v17  ;;  %v502_v19 = vadd.f32 %v611_v18, %v573_v12 }
 0x233   :  { %506 = vst [vmem:[#allocation9 + $0x8] sm:$0xff] %v502_v19 }
 0x234   :  { %786 = shalt.err (!%p783_p8)
}
 0x235   :  { %s787_s1 = scalar_lea.hbm %s935_s6, 256 }
 0x236   :  { %p788_p9 = scmp.ne.s32.totalorder %s935_s6, %s787_s1  ;;  %p791_p10 = scmp.lt.u32.totalorder %s787_s1, %s935_s6 }
 0x238   :  { %p793_p11 = pnand %p791_p10, %p788_p9 }
 0x23a   :  { %796 = shalt.err (!%p793_p11)
}
 0x23b   :  { %530 = dma.vmem_to_hbm [thread:$0]  %s525_s9, 256, %s935_s6, [#allocation10], %s806_s7, %s806_s7, %s807_s8  }
 0x23c   :  { %801 = dma.done.wait [#allocation4], 512  }
 0x23d   :  { %802 = vsyncadd [#allocation4], 4294966784 }
 0x23e   :  { %803 = dma.done.wait [#allocation10], 256  }
 0x23f   :  { %804 = vsyncadd [#allocation10], 4294967040 }
 0x240   :  { %537 = vsyncpa [#allocation3], 1 }
 0x241   :  { %538 = vsyncpa [#allocation6], 1 }
 0x242   :  { %539 = vsyncpa [#allocation4], 1 }
 0x243   :  { %540 = vsyncpa [#allocation10], 1 }

</bundles_post_ra>
